<compile_context>
chip_gen: v7x
topology: tpu7x:2x2x1
jax: 0.10.0
libtpu: 0.0.40
codegen_flags: <defaults>
</compile_context>

<pallas_src>
import math
from functools import partial

import jax
import jax.numpy as jnp
import numpy as np
from jax.experimental import pallas as pl
from jax.experimental.pallas import tpu as pltpu


def _sparse_attn_kernel(x_ref, wq_ref, wkv_ref, o_ref, k_scr, v_scr, *,
                        k_keep, scale, tq):
    # x_ref  : (1, N, C)  full sequence for the current batch element
    # wq_ref : (C, C)     Q projection (pre-transposed)
    # wkv_ref: (C, 2C)    fused K|V projection (pre-transposed)
    # o_ref  : (1, TQ, C) output block for the current query tile
    # k_scr/v_scr: (N, C) VMEM scratch, persistent across the query-tile axis
    qi = pl.program_id(1)
    n_keys, c = k_scr.shape

    # ---- once per batch element: project K and V for the full sequence ------
    @pl.when(qi == 0)
    def _():
        xf = x_ref[0].astype(jnp.float32)                            # (N, C)
        kv = jnp.dot(xf, wkv_ref[...].astype(jnp.float32),
                     preferred_element_type=jnp.float32)             # (N, 2C)
        k_scr[...] = kv[:, :c]
        v_scr[...] = kv[:, c:]

    # ---- Q for this query tile (scale folded into Q: N*C muls, not N*N) -----
    row0 = pl.multiple_of(qi * tq, tq)
    xq = x_ref[0, pl.ds(row0, tq), :].astype(jnp.float32)            # (TQ, C)
    q = jnp.dot(xq, wq_ref[...].astype(jnp.float32),
                preferred_element_type=jnp.float32) * jnp.float32(scale)

    # ---- scores: contract on the last dims, no explicit K^T -----------------
    s = jax.lax.dot_general(
        q, k_scr[...],
        dimension_numbers=(((1,), (1,)), ((), ())),
        preferred_element_type=jnp.float32)                          # (TQ, N)

    # ---- exact per-row top-k threshold ---------------------------------------
    # Order-preserving int32 encoding of f32: positive floats map to their own
    # bits, negative floats to bits ^ 0x7FFFFFFF, so (s1 <= s2) <=> (key1 <= key2).
    bits = pltpu.bitcast(s, jnp.int32)                               # (TQ, N)
    okey = jnp.where(bits < 0, bits ^ jnp.int32(0x7FFFFFFF), bits)

    kk = jnp.float32(k_keep)

    def count_ge(t):                                                 # t: (TQ,1) / scalar
        return jnp.sum((okey >= t).astype(jnp.float32), axis=-1, keepdims=True)

    # Build the largest threshold T with count(okey >= T) >= k, MSB first.
    # After 1 + 31 steps, T equals the k-th largest key exactly (ties kept,
    # same convention as `attn >= kth_value` on the reference side).
    thr = jnp.where(count_ge(jnp.int32(0)) >= kk,
                    jnp.int32(0), jnp.int32(-(2 ** 31)))             # (TQ, 1)
    step0 = jnp.full((1, 1), 1 << 30, jnp.int32)

    def bisect(_, carry):
        t, step = carry
        cand = t + step
        t = jnp.where(count_ge(cand) >= kk, cand, t)
        return t, jnp.right_shift(step, 1)

    thr, _ = jax.lax.fori_loop(0, 31, bisect, (thr, step0))
    keep = okey >= thr                                               # (TQ, N)

    # ---- masked softmax -------------------------------------------------------
    # Masked entries contribute exactly 0.0, identical to exp(-1e10 - m) in f32,
    # so this matches masked_fill(-1e10) + softmax for any realistic scores.
    neg_big = jnp.float32(-1e10)
    m = jnp.max(jnp.where(keep, s, neg_big), axis=-1, keepdims=True)
    e = jnp.where(keep, jnp.exp(s - m), jnp.float32(0.0))
    denom = jnp.sum(e, axis=-1, keepdims=True)
    p = e * pl.reciprocal(denom)          # EUP reciprocal instead of VALU divide

    out = jnp.dot(p, v_scr[...], preferred_element_type=jnp.float32)  # (TQ, C)
    o_ref[0] = out.astype(o_ref.dtype)


def sparse_attention(x, w_qkv, sparsity=0.8, tq=None):
    """x: (B, N, C) float32.  w_qkv: (3C, C) — the nn.Linear weight (no bias)."""
    B, N, C = x.shape
    k_keep = int(N * sparsity)      # note: k_keep == 0 is degenerate (as in torch)
    scale = 1.0 / math.sqrt(C)

    # Pick a query-tile size: multiple of 8 sublanes, dividing N. Larger tiles
    # (256-512) pay off on v6e's 128 MiB VMEM; keep smaller on v7x.
    if tq is None:
        tq = N
        for cand in (512, 256, 128, 64, 32, 16, 8):
            if cand <= N and N % cand == 0:
                tq = cand
                break
    assert N % tq == 0 and (tq % 8 == 0 or tq == N)

    # Split the Linear weight: y = x @ W^T.  Q gets its own (C,C) weight; K and
    # V are fused into one (C, 2C) weight so the per-batch K/V projection is a
    # single wide MXU matmul.
    wq = jnp.asarray(w_qkv[:C, :].T)         # (C, C)
    wkv = jnp.asarray(w_qkv[C:, :].T)        # (C, 2C)

    kernel = partial(_sparse_attn_kernel, k_keep=k_keep, scale=scale, tq=tq)

    flops = 2 * B * (3 * N * C * C + 2 * N * N * C) + 40 * B * N * N
    cost = pl.CostEstimate(
        flops=flops,
        transcendentals=B * N * N,
        bytes_accessed=4 * (2 * B * N * C + 3 * C * C))

    return pl.pallas_call(
        kernel,
        out_shape=jax.ShapeDtypeStruct((B, N, C), x.dtype),
        grid_spec=pltpu.PrefetchScalarGridSpec(
            num_scalar_prefetch=0,
            grid=(B, N // tq),
            in_specs=[
                pl.BlockSpec((1, N, C), lambda b, q: (b, 0, 0)),   # x (full seq)
                pl.BlockSpec((C, C), lambda b, q: (0, 0)),         # wq (resident)
                pl.BlockSpec((C, 2 * C), lambda b, q: (0, 0)),     # wkv (resident)
            ],
            out_specs=pl.BlockSpec((1, tq, C), lambda b, q: (b, q, 0)),
            scratch_shapes=[
                pltpu.VMEM((N, C), jnp.float32),   # K cache (per batch element)
                pltpu.VMEM((N, C), jnp.float32),   # V cache (per batch element)
            ],
        ),
        compiler_params=pltpu.CompilerParams(
            dimension_semantics=("parallel", "arbitrary")),
        cost_estimate=cost,
    )(x, wq, wkv)


def _reference(x, w_qkv, sparsity=0.8):
    # Pure-JAX reference mirroring the PyTorch forward.
    B, N, C = x.shape
    qkv = jnp.einsum("bnc,oc->bno", x, w_qkv)
    q, k, v = jnp.split(qkv, 3, axis=-1)
    attn = jnp.einsum("bnc,bmc->bnm", q, k) / math.sqrt(C)
    k_keep = int(N * sparsity)
    thresh = jax.lax.top_k(attn, k_keep)[0][..., -1:]
    attn = jnp.where(attn >= thresh, attn, -10000000000.0)
    attn = jax.nn.softmax(attn, axis=-1)
    return jnp.einsum("bnm,bmc->bnc", attn, v)


if __name__ == "__main__":
    # Small but representative shapes: C=128 keeps the output lane-dense and
    # tq=8 gives two query tiles per batch element, exercising the K/V cache.
    B, N, C = 2, 16, 128
    sparsity = 0.8

    key = jax.random.PRNGKey(0)
    kx, kw = jax.random.split(key)
    x = jax.random.normal(kx, (B, N, C), dtype=jnp.float32)
    bound = 1.0 / math.sqrt(C)
    w_qkv = jax.random.uniform(kw, (3 * C, C), dtype=jnp.float32,
                               minval=-bound, maxval=bound)

    out = sparse_attention(x, w_qkv, sparsity, tq=8)
    out = jax.block_until_ready(out)

    ref = _reference(x, w_qkv, sparsity)
    np.testing.assert_allclose(np.asarray(out), np.asarray(ref),
                               rtol=2e-5, atol=2e-5)

    print("KERNEL_OK")
</pallas_src>

<mosaic_0001>
module attributes {stable_mosaic.version = 11 : i64} {
  func.func @_sparse_attn_kernel(%arg0: i32, %arg1: i32, %arg2: memref<1x16x128xf32, #tpu.memory_space<vmem>>, %arg3: memref<128x128xf32, #tpu.memory_space<vmem>>, %arg4: memref<128x256xf32, #tpu.memory_space<vmem>>, %arg5: memref<1x8x128xf32, #tpu.memory_space<vmem>>, %arg6: memref<16x128xf32, #tpu.memory_space<vmem>>, %arg7: memref<16x128xf32, #tpu.memory_space<vmem>>) attributes {dimension_semantics = [#tpu.dimension_semantics<parallel>, #tpu.dimension_semantics<arbitrary>], iteration_bounds = array<i64: 2, 2>, scalar_prefetch = 0 : i64, scratch_operands = 2 : i64, tpu.core_type = #tpu.core_type<tc>, window_params = [{transform_indices = @transform_0, window_bounds = array<i64: 1, 16, 128>}, {pipeline_mode = #tpu.pipeline_mode<synchronous>, transform_indices = @transform_1, window_bounds = array<i64: 128, 128>}, {pipeline_mode = #tpu.pipeline_mode<synchronous>, transform_indices = @transform_2, window_bounds = array<i64: 128, 256>}, {transform_indices = @transform_3, window_bounds = array<i64: 1, 8, 128>}]} {
    %c0_i32 = arith.constant 0 : i32
    %0 = arith.cmpi eq, %arg1, %c0_i32 : i32
    %1 = arith.extui %0 : i1 to i32
    %c0_i32_0 = arith.constant 0 : i32
    %2 = arith.cmpi ne, %1, %c0_i32_0 : i32
    scf.if %2 {
      %c0_25 = arith.constant 0 : index
      %c0_26 = arith.constant 0 : index
      %c0_27 = arith.constant 0 : index
      %55 = vector.load %arg2[%c0_25, %c0_26, %c0_27] : memref<1x16x128xf32, #tpu.memory_space<vmem>>, vector<1x16x128xf32>
      %56 = vector.shape_cast %55 : vector<1x16x128xf32> to vector<16x128xf32>
      %c0_28 = arith.constant 0 : index
      %c0_29 = arith.constant 0 : index
      %57 = vector.load %arg4[%c0_28, %c0_29] : memref<128x256xf32, #tpu.memory_space<vmem>>, vector<128x256xf32>
      %cst_30 = arith.constant dense<0.000000e+00> : vector<16x256xf32>
      %58 = tpu.matmul %56, %57, %cst_30 {dimension_numbers = #tpu.dot_dimension_numbers<[1], [0], [0], [1], [0, 0, 1, 1], [], []>} : vector<16x128xf32>, vector<128x256xf32>, vector<16x256xf32> -> vector<16x256xf32>
      %59 = vector.extract_strided_slice %58 {offsets = [0, 0], sizes = [16, 128], strides = [1, 1]} : vector<16x256xf32> to vector<16x128xf32>
      %c0_31 = arith.constant 0 : index
      %c0_32 = arith.constant 0 : index
      %60 = vector.load %arg6[%c0_31, %c0_32] : memref<16x128xf32, #tpu.memory_space<vmem>>, vector<16x128xf32>
      tpu.vector_store %arg6[%c0_31, %c0_32], %59 {strides = array<i32>} : memref<16x128xf32, #tpu.memory_space<vmem>>, vector<16x128xf32>,
      %61 = vector.extract_strided_slice %58 {offsets = [0, 128], sizes = [16, 128], strides = [1, 1]} : vector<16x256xf32> to vector<16x128xf32>
      %c0_33 = arith.constant 0 : index
      %c0_34 = arith.constant 0 : index
      %62 = vector.load %arg7[%c0_33, %c0_34] : memref<16x128xf32, #tpu.memory_space<vmem>>, vector<16x128xf32>
      tpu.vector_store %arg7[%c0_33, %c0_34], %61 {strides = array<i32>} : memref<16x128xf32, #tpu.memory_space<vmem>>, vector<16x128xf32>,
    } else {
    }
    %c8_i32 = arith.constant 8 : i32
    %3 = arith.muli %arg1, %c8_i32 : i32
    %4 = tpu.assume_multiple %3, 8 : i32
    %c0 = arith.constant 0 : index
    %5 = arith.index_cast %4 : i32 to index
    %c0_1 = arith.constant 0 : index
    %6 = vector.load %arg2[%c0, %5, %c0_1] : memref<1x16x128xf32, #tpu.memory_space<vmem>>, vector<1x8x128xf32>
    %7 = vector.shape_cast %6 : vector<1x8x128xf32> to vector<8x128xf32>
    %c0_2 = arith.constant 0 : index
    %c0_3 = arith.constant 0 : index
    %8 = vector.load %arg3[%c0_2, %c0_3] : memref<128x128xf32, #tpu.memory_space<vmem>>, vector<128x128xf32>
    %cst = arith.constant dense<0.000000e+00> : vector<8x128xf32>
    %9 = tpu.matmul %7, %8, %cst {dimension_numbers = #tpu.dot_dimension_numbers<[1], [0], [0], [1], [0, 0, 1, 1], [], []>} : vector<8x128xf32>, vector<128x128xf32>, vector<8x128xf32> -> vector<8x128xf32>
    %cst_4 = arith.constant 0.0883883461 : f32
    %10 = vector.broadcast %cst_4 : f32 to vector<8x128xf32>
    %11 = arith.mulf %9, %10 : vector<8x128xf32>
    %c0_5 = arith.constant 0 : index
    %c0_6 = arith.constant 0 : index
    %12 = vector.load %arg6[%c0_5, %c0_6] : memref<16x128xf32, #tpu.memory_space<vmem>>, vector<16x128xf32>
    %cst_7 = arith.constant dense<0.000000e+00> : vector<8x16xf32>
    %13 = tpu.matmul %11, %12, %cst_7 {dimension_numbers = #tpu.dot_dimension_numbers<[1], [1], [0], [0], [0, 0, 1, 0], [], []>} : vector<8x128xf32>, vector<16x128xf32>, vector<8x16xf32> -> vector<8x16xf32>
    %14 = tpu.bitcast %13 : vector<8x16xf32> -> vector<8x16xi32>
    %c0_i32_8 = arith.constant 0 : i32
    %15 = vector.broadcast %c0_i32_8 : i32 to vector<8x16xi32>
    %16 = arith.cmpi slt, %14, %15 : vector<8x16xi32>
    %c2147483647_i32 = arith.constant 2147483647 : i32
    %17 = vector.broadcast %c2147483647_i32 : i32 to vector<8x16xi32>
    %18 = arith.xori %14, %17 : vector<8x16xi32>
    %19 = arith.select %16, %18, %14 : vector<8x16xi1>, vector<8x16xi32>
    %c0_i32_9 = arith.constant 0 : i32
    %20 = vector.broadcast %c0_i32_9 : i32 to vector<8x16xi32>
    %21 = arith.cmpi sge, %19, %20 : vector<8x16xi32>
    %22 = arith.extui %21 : vector<8x16xi1> to vector<8x16xi32>
    %23 = arith.sitofp %22 : vector<8x16xi32> to vector<8x16xf32>
    %cst_10 = arith.constant dense<0.000000e+00> : vector<8xf32>
    %24 = vector.multi_reduction <add>, %23, %cst_10 [1] : vector<8x16xf32> to vector<8xf32>
    %25 = vector.shape_cast %24 : vector<8xf32> to vector<8x1xf32>
    %cst_11 = arith.constant 1.200000e+01 : f32
    %26 = vector.broadcast %cst_11 : f32 to vector<8x1xf32>
    %27 = arith.cmpf oge, %25, %26 : vector<8x1xf32>
    %c0_i32_12 = arith.constant 0 : i32
    %c-2147483648_i32 = arith.constant -2147483648 : i32
    %28 = vector.broadcast %c0_i32_12 : i32 to vector<8x1xi32>
    %29 = vector.broadcast %c-2147483648_i32 : i32 to vector<8x1xi32>
    %30 = arith.select %27, %28, %29 : vector<8x1xi1>, vector<8x1xi32>
    %c1073741824_i32 = arith.constant 1073741824 : i32
    %31 = vector.broadcast %c1073741824_i32 : i32 to vector<1x1xi32>
    %cst_13 = arith.constant 1.200000e+01 : f32
    %c0_i32_14 = arith.constant 0 : i32
    %c31_i32 = arith.constant 31 : i32
    %32 = arith.addi %c0_i32_14, %c31_i32 : i32
    %c1_i32 = arith.constant 1 : i32
    %33:2 = scf.for %arg8 = %c0_i32_14 to %32 step %c1_i32 iter_args(%arg9 = %30, %arg10 = %31) -> (vector<8x1xi32>, vector<1x1xi32>)  : i32 {
      %55 = vector.broadcast %arg10 : vector<1x1xi32> to vector<8x1xi32>
      %56 = arith.addi %arg9, %55 : vector<8x1xi32>
      %57 = vector.broadcast %56 : vector<8x1xi32> to vector<8x16xi32>
      %58 = arith.cmpi sge, %19, %57 : vector<8x16xi32>
      %59 = arith.extui %58 : vector<8x16xi1> to vector<8x16xi32>
      %60 = arith.sitofp %59 : vector<8x16xi32> to vector<8x16xf32>
      %cst_25 = arith.constant dense<0.000000e+00> : vector<8xf32>
      %61 = vector.multi_reduction <add>, %60, %cst_25 [1] : vector<8x16xf32> to vector<8xf32>
      %62 = vector.shape_cast %61 : vector<8xf32> to vector<8x1xf32>
      %63 = vector.broadcast %cst_13 : f32 to vector<8x1xf32>
      %64 = arith.cmpf oge, %62, %63 : vector<8x1xf32>
      %65 = arith.select %64, %56, %arg9 : vector<8x1xi1>, vector<8x1xi32>
      %c1_i32_26 = arith.constant 1 : i32
      %66 = vector.broadcast %c1_i32_26 : i32 to vector<1x1xi32>
      %67 = arith.shrsi %arg10, %66 : vector<1x1xi32>
      scf.yield %65, %67 : vector<8x1xi32>, vector<1x1xi32>
    }
    %34 = vector.broadcast %33#0 : vector<8x1xi32> to vector<8x16xi32>
    %35 = arith.cmpi sge, %19, %34 : vector<8x16xi32>
    %cst_15 = arith.constant -1.000000e+10 : f32
    %36 = vector.broadcast %cst_15 : f32 to vector<8x16xf32>
    %37 = arith.select %35, %13, %36 : vector<8x16xi1>, vector<8x16xf32>
    %cst_16 = arith.constant dense<0xFF800000> : vector<8xf32>
    %38 = vector.multi_reduction <maximumf>, %37, %cst_16 [1] : vector<8x16xf32> to vector<8xf32>
    %39 = vector.shape_cast %38 : vector<8xf32> to vector<8x1xf32>
    %40 = vector.broadcast %39 : vector<8x1xf32> to vector<8x16xf32>
    %41 = arith.subf %13, %40 : vector<8x16xf32>
    %42 = math.exp %41 : vector<8x16xf32>
    %cst_17 = arith.constant 0.000000e+00 : f32
    %43 = vector.broadcast %cst_17 : f32 to vector<8x16xf32>
    %44 = arith.select %35, %42, %43 : vector<8x16xi1>, vector<8x16xf32>
    %cst_18 = arith.constant dense<0.000000e+00> : vector<8xf32>
    %45 = vector.multi_reduction <add>, %44, %cst_18 [1] : vector<8x16xf32> to vector<8xf32>
    %46 = vector.shape_cast %45 : vector<8xf32> to vector<8x1xf32>
    %47 = tpu.reciprocal %46 : vector<8x1xf32> -> vector<8x1xf32>
    %48 = vector.broadcast %47 : vector<8x1xf32> to vector<8x16xf32>
    %49 = arith.mulf %44, %48 : vector<8x16xf32>
    %c0_19 = arith.constant 0 : index
    %c0_20 = arith.constant 0 : index
    %50 = vector.load %arg7[%c0_19, %c0_20] : memref<16x128xf32, #tpu.memory_space<vmem>>, vector<16x128xf32>
    %cst_21 = arith.constant dense<0.000000e+00> : vector<8x128xf32>
    %51 = tpu.matmul %49, %50, %cst_21 {dimension_numbers = #tpu.dot_dimension_numbers<[1], [0], [0], [1], [0, 0, 1, 1], [], []>} : vector<8x16xf32>, vector<16x128xf32>, vector<8x128xf32> -> vector<8x128xf32>
    %c0_22 = arith.constant 0 : index
    %c0_23 = arith.constant 0 : index
    %c0_24 = arith.constant 0 : index
    %52 = vector.load %arg5[%c0_22, %c0_23, %c0_24] : memref<1x8x128xf32, #tpu.memory_space<vmem>>, vector<1x8x128xf32>
    %53 = vector.shape_cast %52 : vector<1x8x128xf32> to vector<8x128xf32>
    %54 = vector.shape_cast %51 : vector<8x128xf32> to vector<1x8x128xf32>
    tpu.vector_store %arg5[%c0_22, %c0_23, %c0_24], %54 {strides = array<i32>} : memref<1x8x128xf32, #tpu.memory_space<vmem>>, vector<1x8x128xf32>,
    return
  }
  func.func @transform_0(%arg0: i32, %arg1: i32) -> (i32, i32, i32) {
    %c0_i32 = arith.constant 0 : i32
    %c0_i32_0 = arith.constant 0 : i32
    %c0_i32_1 = arith.constant 0 : i32
    return %arg0, %c0_i32, %c0_i32_0 : i32, i32, i32
  }
  func.func @transform_1(%arg0: i32, %arg1: i32) -> (i32, i32) {
    %c0_i32 = arith.constant 0 : i32
    %c0_i32_0 = arith.constant 0 : i32
    %c0_i32_1 = arith.constant 0 : i32
    return %c0_i32, %c0_i32_0 : i32, i32
  }
  func.func @transform_2(%arg0: i32, %arg1: i32) -> (i32, i32) {
    %c0_i32 = arith.constant 0 : i32
    %c0_i32_0 = arith.constant 0 : i32
    %c0_i32_1 = arith.constant 0 : i32
    return %c0_i32, %c0_i32_0 : i32, i32
  }
  func.func @transform_3(%arg0: i32, %arg1: i32) -> (i32, i32, i32) {
    %c0_i32 = arith.constant 0 : i32
    %c0_i32_0 = arith.constant 0 : i32
    return %arg0, %arg1, %c0_i32 : i32, i32, i32
  }
}

</mosaic_0001>

<bundles_post_ra>
// kernel: tpu_custom_call.1
= control target key start
LH: loop header
LB: loop body
LE: loop exit
PB: predicated region body
PF: predicated region fallthrough
CT: control target
= control target key end

     0   :  { %s1713_s0 = inlined_call_operand.hbm [shape: f32[2,16,128], index: 0, kind: input, shape index: {}]   ;;  %s1714_s1 = inlined_call_operand.hbm [shape: f32[128,128], index: 1, kind: input, shape index: {}]   ;;  %s1715_s2 = inlined_call_operand.hbm [shape: f32[128,256], index: 2, kind: input, shape index: {}]   ;;  %s1716_s3 = inlined_call_operand.hbm [shape: f32[2,16,128], index: 3, kind: output, shape index: {}]  }
   0x1   :  { %1728 = sst [smem:[#allocation18_spill]] %s1714_s1 }
   0x2   :  { %1729 = sst [smem:[#allocation19_spill]] %s1715_s2 }
   0x3   :  { %8 = vsyncpa [#allocation5], 0 }
   0x4   :  { %10 = vsyncpa [#allocation5 + $0x1], 0 }
   0x5   :  { %11 = vsyncpa [#allocation8], 0 }
   0x6   :  { %12 = vsyncpa [#allocation6], 0 }
   0x7   :  { %14 = vsyncpa [#allocation6 + $0x1], 0  ;;  %s1373_s12 = smov 0   ;;  %s1375_s13 = smov 0  }
   0x8   :  { %s1377_s14 = smov 0   ;;  %s1379_s15 = smov 0  }
   0x9   :  { %s1381_s16 = smov 0   ;;  %s1383_s17 = smov 0  }
   0xa   :  { %s1385_s18 = smov 0   ;;  %s1387_s19 = smov 0  }
   0xb   :  { %s1389_s20 = smov 0   ;;  %s1391_s21 = smov 0  }
   0xc   :  { %s1393_s22 = smov 0  }
   0xd LB: > { %1730 = sst [smem:[#allocation14_spill]] %s1285_s12  ;;  %s765_s23 = sadd.s32 4294967295, %s1325_s22   ;;  %s1325_s22 = sphi %s1393_s22, %s20_s22   ;;  %s1321_s21 = sphi %s1391_s21, %s1763_s21   ;;  %s1317_s20 = sphi %s1389_s20, %s1755_s20   ;;  %s1313_s19 = sphi %s1387_s19, %s1762_s19   ;;  %s1309_s18 = sphi %s1385_s18, %s1754_s18   ;;  %s1305_s17 = sphi %s1383_s17, %s1761_s17   ;;  %s1301_s16 = sphi %s1381_s16, %s1760_s16   ;;  %s1297_s15 = sphi %s1379_s15, %s1759_s15   ;;  %s1293_s14 = sphi %s1377_s14, %s1758_s14   ;;  %s1289_s13 = sphi %s1375_s13, %s1757_s13   ;;  %s1285_s12 = sphi %s1373_s12, %s1756_s12  }
   0xe   : > { %1731 = sst [smem:[#allocation15_spill]] %s1317_s20  ;;  %s766_s24 = sadd.s32 4294967294, %s1325_s22  }
   0xf   : > { %p52_p0 = scmp.ne.s32.totalorder %s1301_s16, %s1297_s15  ;;  %p1429_p1 = scmp.eq.s32.totalorder %s765_s23, 0 }
  0x10   : > { %p119_p2 = scmp.ne.s32.totalorder %s1293_s14, %s1289_s13  ;;  %p120_p4 = scmp.eq.s32.totalorder %s765_s23, 3 }
  0x11   : > { %s1732_s25 = scalar_select %p1429_p1, 1, 0 }
  0x12   : > { %p1438_p3 = por %p1429_p1, %p52_p0  ;;  %p125_p5 = scmp.ne.s32.totalorder %s1289_s13, %s1285_s12 }
  0x13   : > { %p126_p6 = scmp.eq.s32.totalorder %s766_s24, 3  ;;  %p1444_p7 = por %p120_p4, %p119_p2 }
  0x14   : > { %s1733_s27 = scalar_select %p1438_p3, 1, 0 }
  0x15   : > { %s1734_s28 = scalar_select %p1444_p7, 1, 0 }
  0x16   : > { %p767_p8 = scmp.ge.s32.totalorder %s1325_s22, 1  ;;  %p1449_p9 = por %p126_p6, %p125_p5 }
  0x17   : > { %p133_p10 = scmp.lt.s32.totalorder %s1325_s22, 5  ;;  %s1339_s4 = smov [#allocation7]  }
  0x18   : > { %s1735_s29 = scalar_select %p1449_p9, 1, 0 }
  0x19   : > { %p1454_p11 = pnand %p767_p8, %p133_p10  ;;  %s145_s5 = sshll.u32 %s1339_s4, 4  ;;  %s146_s5 = int_to_ptr.vmem [resolvable:$true] %s145_s5 }
  0x1a   : > { %1736 = sst [smem:[#allocation16_spill]] %s1735_s29  ;;  %s1340_s7 = smov [#allocation9]  }
  0x1b   : > { %s1737_s30 = scalar_select %p1454_p11, 1, 0 }
  0x1c   : > { %p952_p12 = pneg %p1454_p11  ;;  %s158_s8 = sshll.u32 %s1340_s7, 4  ;;  %s1466_s8 = int_to_ptr.vmem [resolvable:$true] %s158_s8 }
  0x1d   : > { %s1739_s1 = sld [smem:[#allocation18_spill]] }
  0x1e   : > { %p1462_p13 = pnand %p952_p12, %p1429_p1 }
  0x20   : > { %p1103_p2 = pneg %p1462_p13 }
  0x23   : > { %s1101_s11 = scalar_lea.hbm %s1739_s1, 2048 }
  0x24   : > { %p1102_p0 = scmp.ne.s32.totalorder %s1739_s1, %s1101_s11  ;;  %p1108_p6 = scmp.lt.u32.totalorder %s1101_s11, %s1739_s1 }
  0x26   : > { %p1104_p4 = pnand %p1103_p2, %p1102_p0 }
  0x28   : > { %p1105_p5 = pneg %p1104_p4 }
  0x2a   : > { %p1110_p8 = pnand %p1108_p6, %p1105_p5 }
  0x2c   : > { %1113 = shalt.err (!%p1110_p8)
}
  0x2d   : > { %s1114_s7 = scalar_lea.vmem %s146_s5, 2048  ;;  %p1122_p7 = scmp.lt.s32.totalorder %s146_s5, %s146_s5 }
  0x2e   : > { %p1115_p10 = scmp.ne.s32.totalorder %s146_s5, %s1114_s7  ;;  %p1123_p1 = scmp.lt.s32.totalorder %s1114_s7, %s1114_s7 }
  0x30   : > { %p1117_p12 = pnand %p1115_p10, %p1103_p2  ;;  %p1124_p3 = por %p1123_p1, %p1122_p7 }
  0x32   : > { %p1118_p9 = pneg %p1117_p12 }
  0x34   : > { %p1125_p11 = pnand %p1124_p3, %p1118_p9 }
  0x36   : > { %1128 = shalt.err (!%p1125_p11)
}
  0x37   : > { %s1724_s9 = smov 128   ;;  %s1725_s10 = smov 8  }
  0x38   : > { %955 = dma.hbm_to_vmem [thread:$0]  (!%p1462_p13), %s1739_s1, 2048, %s146_s5, [#allocation8], %s1724_s9, %s1724_s9, %s1725_s10  }
  0x39   : > { %s1740_s2 = sld [smem:[#allocation19_spill]] }
  0x3f   : > { %s1129_s4 = scalar_lea.hbm %s1740_s2, 4096 }
  0x40   : > { %p1130_p1 = scmp.ne.s32.totalorder %s1740_s2, %s1129_s4  ;;  %p1136_p9 = scmp.lt.u32.totalorder %s1129_s4, %s1740_s2 }
  0x42   : > { %p1132_p3 = pnand %p1130_p1, %p1103_p2 }
  0x44   : > { %p1133_p7 = pneg %p1132_p3 }
  0x46   : > { %p1138_p11 = pnand %p1136_p9, %p1133_p7 }
  0x48   : > { %1141 = shalt.err (!%p1138_p11)
}
  0x49   : > { %s1142_s5 = scalar_lea.vmem %s1466_s8, 4096  ;;  %p1150_p6 = scmp.lt.s32.totalorder %s1466_s8, %s1466_s8 }
  0x4a   : > { %p1143_p0 = scmp.ne.s32.totalorder %s1466_s8, %s1142_s5  ;;  %p1151_p8 = scmp.lt.s32.totalorder %s1142_s5, %s1142_s5 }
  0x4c   : > { %p1145_p4 = pnand %p1143_p0, %p1103_p2  ;;  %p1152_p10 = por %p1151_p8, %p1150_p6 }
  0x4e   : > { %p1146_p5 = pneg %p1145_p4 }
  0x50   : > { %p1153_p12 = pnand %p1152_p10, %p1146_p5 }
  0x52   : > { %1156 = shalt.err (!%p1153_p12)
}
  0x53   : > { %s1343_s12 = smov 256   ;;  %s1344_s26 = smov 16  }
  0x54   : > { %958 = dma.hbm_to_vmem [thread:$0]  (!%p1462_p13), %s1740_s2, 4096, %s1466_s8, [#allocation8], %s1343_s12, %s1343_s12, %s1344_s26  }
  0x55   : > { %s29_s15 = sadd.s32 1, %s1317_s20  ;;  %s32_s23 = sadd.s32 1, %s1321_s21 }
  0x56   : > { %p30_p2 = scmp.ge.s32.totalorder %s29_s15, 2  ;;  %s39_s24 = sadd.s32 1, %s1305_s17 }
  0x57   : > { %p46_p1 = scmp.ne.s32.totalorder %s1305_s17, %s1301_s16  ;;  %p47_p3 = scmp.eq.s32.totalorder %s1325_s22, 0 }
  0x58   : > { %s1765_s15 = smov (%p30_p2, %s29_s15), 0  ;;  %s1767_s23 = smov (!%p30_p2, %s32_s23), %s1321_s21 }
  0x59   : > { %1741 = sst [smem:[#allocation17_spill]] %s1765_s15  ;;  %p1527_p7 = por %p47_p3, %p46_p1 }
  0x5a   : > { %s105_s4 = ssub.s32 %s1317_s20, %s1765_s15  ;;  %p34_p13 = scmp.ge.s32.totalorder %s1767_s23, 2 }
  0x5b   : > { %p969_p9 = scmp.lt.s32.totalorder %s1325_s22, 4  ;;  %s172_s8 = sand.u32 1, %s1305_s17  }
  0x5c   : > { %s789_s7 = sshll.u32 %s1321_s21, 8  ;;  %s1769_s23 = smov (%p34_p13, %s1767_s23), 0 }
  0x5d   : > { %s771_s5 = sshll.u32 %s172_s8, 4  ;;  %s36_s12 = ssub.s32 %s1321_s21, %s1769_s23 }
  0x5e   : > { %p37_p11 = scmp.eq.s32.totalorder %s36_s12, 0  ;;  %s106_s26 = sor.u32 %s105_s4, %s36_s12 }
  0x5f   : > { %p107_p0 = scmp.eq.s32.totalorder %s106_s26, 0  ;;  %s1543_s9 = scalar_lea.hbm %s1713_s0, %s789_s7 }
  0x60   : > { %s1546_s10 = scalar_select %p37_p11, %s1305_s17, %s39_s24  }
  0x61   : > { %s1743_s1 = sadd.s32 1, %s1293_s14  ;;  %s176_s15 = scalar_lea.vmem [#allocation4], %s771_s5 }
  0x62   : > { %s1551_s2 = scalar_select %p107_p0, %s1293_s14, %s1743_s1  }
  0x63   : > { %s183_s20 = sshll.u32 %s176_s15, 4  ;;  %p1557_p4 = pnand %p969_p9, %p1527_p7  ;;  %s1561_s20 = int_to_ptr.vmem [resolvable:$true] %s183_s20 }
  0x64   : > { %s1563_s7 = scalar_lea.sflag [#allocation5], %s172_s8  ;;  %s1157_s24 = scalar_lea.hbm %s1543_s9, 256 }
  0x65   : > { %p1158_p5 = scmp.ne.s32.totalorder %s1543_s9, %s1157_s24  ;;  %p1159_p6 = pneg %p1557_p4 }
  0x66   : > { %s1162_s6 = scalar_lea.hbm %s1713_s0, 512  ;;  %p1163_p12 = scmp.lt.u32.totalorder %s1543_s9, %s1713_s0 }
  0x67   : > { %p1160_p8 = pnand %p1159_p6, %p1158_p5  ;;  %p1164_p2 = scmp.lt.u32.totalorder %s1162_s6, %s1157_s24 }
  0x68   : > { %p1166_p3 = scmp.lt.u32.totalorder %s1157_s24, %s1543_s9 }
  0x69   : > { %p1161_p10 = pneg %p1160_p8  ;;  %p1165_p1 = por %p1164_p2, %p1163_p12 }
  0x6b   : > { %p1167_p7 = por %p1166_p3, %p1165_p1 }
  0x6d   : > { %p1168_p13 = pnand %p1167_p7, %p1161_p10 }
  0x6f   : > { %1171 = shalt.err (!%p1168_p13)
}
  0x70   : > { %s1172_s8 = scalar_lea.vmem %s1561_s20, 256  ;;  %s1345_s26 = smov [#allocation4]  }
  0x71   : > { %p1173_p9 = scmp.ne.s32.totalorder %s1561_s20, %s1172_s8  ;;  %s1177_s29 = sshll.u32 %s1345_s26, 4  ;;  %s1178_s29 = int_to_ptr.vmem [resolvable:$false] %s1177_s29 }
  0x72   : > { %s1179_s11 = scalar_lea.vmem %s1178_s29, 512  ;;  %p1180_p5 = scmp.lt.s32.totalorder %s1561_s20, %s1178_s29 }
  0x73   : > { %p1175_p11 = pnand %p1173_p9, %p1159_p6  ;;  %p1181_p8 = scmp.lt.s32.totalorder %s1179_s11, %s1172_s8 }
  0x75   : > { %p1176_p0 = pneg %p1175_p11  ;;  %p1182_p12 = por %p1181_p8, %p1180_p5 }
  0x77   : > { %p1183_p2 = pnand %p1182_p12, %p1176_p0 }
  0x79   : > { %1186 = shalt.err (!%p1183_p2)
}
  0x7a   : > { %s1745_s24 = smov 8   ;;  %s1746_s1 = smov 128  }
  0x7b   : > { %962 = dma.hbm_to_vmem [thread:$0]  (!%p1557_p4), %s1543_s9, 256, %s1561_s20, %s1563_s7, %s1746_s1, %s1746_s1, %s1745_s24  }
  0x7c   : > { %p1747_p6 = scmp.ne.s32.totalorder %s1737_s30, 0 }
  0x7d   : > { %s197_s15 = sand.u32 (!%p1747_p6), 1, %s1301_s16   ;;  %p1748_p10 = scmp.ne.s32.totalorder (!%p1747_p6), %s1733_s27, 0 }
  0x7e   : > { %195 = sbr.rel (%p1747_p6) target bundleno = 1690 (0x69a), region = 32  ;;  %s775_s6 = sshll.u32 (!%p1747_p6), %s197_s15, 4 }
  0x7f   : > { %s198_s5 = scalar_lea.sflag (!%p1747_p6), [#allocation5], %s197_s15  ;;  %s1597_s12 = scalar_lea.vmem (!%p1747_p6), [#allocation4], %s775_s6 }
  0x85   : > { %1272 = dma.done.wait (%p1748_p10), %s198_s5, 256  }
  0x86   : > { %1274 = vsyncadd (%p1748_p10), %s198_s5, 4294967040  ;;  %p1749_p1 = scmp.ne.s32.totalorder %s1732_s25, 0 }
  0x88   : > { %1276 = dma.done.wait (%p1749_p1), [#allocation8], 6144  }
  0x89   : > { %1278 = vsyncadd (%p1749_p1), [#allocation8], 4294961152  ;;  %s229_s20 = sand.u32 1, %s1289_s13   ;;  %p779_p4 = scmp.ne.s32.totalorder %s1309_s18, 0 }
  0x8a   : > { %s1610_s30 = sshll.u32 %s229_s20, 3  ;;  %v239_v0 = vld [vmem:[#allocation9 + $0x8] sm:$0xff] (!%p779_p4)  ;;  %v241_v1 = vld [vmem:[#allocation9 + $0x18] sm:$0xff] (!%p779_p4)  ;;  %v238_v2 = vld [vmem:[#allocation9] sm:$0xff] (!%p779_p4)  ;;  %v1346_v7 = vmov (!%p779_p4), 0.0  }
  0x8b   : > { %s231_s9 = scalar_lea.vmem [#allocation10], %s1610_s30  ;;  %235 = sbr.rel (%p779_p4) target bundleno = 387 (0x183), region = 48  ;;  %v862_v3 = vpack.c.bf16 (!%p779_p4), %v241_v1, %v239_v0  ;;  %v240_v4 = vld [vmem:[#allocation9 + $0x10] sm:$0xff] (!%p779_p4)  ;;  %v243_v5 = vld [vmem:[#allocation9 + $0x28] sm:$0xff] (!%p779_p4)  ;;  %v245_v6 = vld [vmem:[#allocation9 + $0x38] sm:$0xff] (!%p779_p4)  ;;  %334 = vmatprep.mubr.f32.mxu0 (!%p779_p4), %v1346_v7  ;;  %340 = vmatprep.mubr.f32.mxu1 (!%p779_p4), %v1346_v7 }
  0x8c   : > { %v864_v8 = vpack.c.bf16 (!%p779_p4), %v240_v4, %v238_v2  ;;  %v866_v9 = vpack.c.bf16 (!%p779_p4), %v245_v6, %v243_v5  ;;  %v242_v10 = vld [vmem:[#allocation9 + $0x20] sm:$0xff] (!%p779_p4)  ;;  %v244_v11 = vld [vmem:[#allocation9 + $0x30] sm:$0xff] (!%p779_p4)  ;;  %v247_v12 = vld [vmem:[#allocation9 + $0x48] sm:$0xff] (!%p779_p4) }
  0x8d   : > { %863 = vmatprep.subr.bf16.mxu0 (!%p779_p4), %v862_v3  ;;  %924 = vmatprep.subr.bf16.mxu1 (!%p779_p4), %v862_v3  ;;  %v249_v13 = vld [vmem:[#allocation9 + $0x58] sm:$0xff] (!%p779_p4)  ;;  %v868_v14 = vpack.c.bf16 (!%p779_p4), %v244_v11, %v242_v10  ;;  %v246_v16 = vld [vmem:[#allocation9 + $0x40] sm:$0xff] (!%p779_p4)  ;;  %v248_v17 = vld [vmem:[#allocation9 + $0x50] sm:$0xff] (!%p779_p4) }
  0x8e   : > { %865 = vmatpush1.bf16.msra.mxu0 (!%p779_p4), %v864_v8  ;;  %932 = vmatpush1.bf16.msra.mxu1 (!%p779_p4), %v864_v8  ;;  %v870_v15 = vpack.c.bf16 (!%p779_p4), %v249_v13, %v247_v12  ;;  %v251_v18 = vld [vmem:[#allocation9 + $0x68] sm:$0xff] (!%p779_p4)  ;;  %v253_v19 = vld [vmem:[#allocation9 + $0x78] sm:$0xff] (!%p779_p4)  ;;  %v872_v20 = vpack.c.bf16 (!%p779_p4), %v248_v17, %v246_v16  ;;  %v250_v22 = vld [vmem:[#allocation9 + $0x60] sm:$0xff] (!%p779_p4) }
  0x8f   : > { %867 = vmatprep.subr.bf16.mxu0 (!%p779_p4), %v866_v9  ;;  %925 = vmatprep.subr.bf16.mxu1 (!%p779_p4), %v866_v9  ;;  %v874_v21 = vpack.c.bf16 (!%p779_p4), %v253_v19, %v251_v18  ;;  %v252_v23 = vld [vmem:[#allocation9 + $0x70] sm:$0xff] (!%p779_p4)  ;;  %v255_v24 = vld [vmem:[#allocation9 + $0x88] sm:$0xff] (!%p779_p4)  ;;  %v257_v25 = vld [vmem:[#allocation9 + $0x98] sm:$0xff] (!%p779_p4) }
  0x90   : > { %v876_v26 = vpack.c.bf16 (!%p779_p4), %v252_v23, %v250_v22  ;;  %v878_v27 = vpack.c.bf16 (!%p779_p4), %v257_v25, %v255_v24  ;;  %v254_v28 = vld [vmem:[#allocation9 + $0x80] sm:$0xff] (!%p779_p4)  ;;  %v256_v29 = vld [vmem:[#allocation9 + $0x90] sm:$0xff] (!%p779_p4)  ;;  %v259_v30 = vld [vmem:[#allocation9 + $0xa8] sm:$0xff] (!%p779_p4) }
  0x91   : > { %v261_v31 = vld [vmem:[#allocation9 + $0xb8] sm:$0xff] (!%p779_p4)  ;;  %v880_v32 = vpack.c.bf16 (!%p779_p4), %v256_v29, %v254_v28  ;;  %v258_v34 = vld [vmem:[#allocation9 + $0xa0] sm:$0xff] (!%p779_p4)  ;;  %v260_v35 = vld [vmem:[#allocation9 + $0xb0] sm:$0xff] (!%p779_p4) }
  0x92   : > { %869 = vmatpush1.bf16.msra.mxu0 %v868_v14  ;;  %933 = vmatpush1.bf16.msra.mxu1 %v868_v14  ;;  %v882_v33 = vpack.c.bf16 %v261_v31, %v259_v30  ;;  %v263_v36 = vld [vmem:[#allocation9 + $0xc8] sm:$0xff]  ;;  %v265_v37 = vld [vmem:[#allocation9 + $0xd8] sm:$0xff]  ;;  %v884_v38 = vpack.c.bf16 %v260_v35, %v258_v34  ;;  %v262_v40 = vld [vmem:[#allocation9 + $0xc0] sm:$0xff] }
  0x93   : > { %871 = vmatprep.subr.bf16.mxu0 %v870_v15  ;;  %926 = vmatprep.subr.bf16.mxu1 %v870_v15  ;;  %v886_v39 = vpack.c.bf16 %v265_v37, %v263_v36  ;;  %v264_v41 = vld [vmem:[#allocation9 + $0xd0] sm:$0xff]  ;;  %v267_v42 = vld [vmem:[#allocation9 + $0xe8] sm:$0xff]  ;;  %v269_v43 = vld [vmem:[#allocation9 + $0xf8] sm:$0xff] }
  0x94   : > { %v888_v44 = vpack.c.bf16 %v264_v41, %v262_v40  ;;  %v890_v45 = vpack.c.bf16 %v269_v43, %v267_v42  ;;  %v266_v46 = vld [vmem:[#allocation9 + $0xe0] sm:$0xff]  ;;  %v268_v47 = vld [vmem:[#allocation9 + $0xf0] sm:$0xff]  ;;  %v237_v50 = vld [vmem:[%s1597_s12 + $0x8] sm:$0xff] }
  0x95   : > { %v892_v48 = vpack.c.bf16 %v268_v47, %v266_v46  ;;  %v236_v49 = vld [vmem:[%s1597_s12] sm:$0xff] }
  0x96   : > { %873 = vmatpush1.bf16.msra.mxu0 %v872_v20  ;;  %934 = vmatpush1.bf16.msra.mxu1 %v872_v20 }
  0x97   : > { %875 = vmatprep.subr.bf16.mxu0 %v874_v21  ;;  %927 = vmatprep.subr.bf16.mxu1 %v874_v21 }
  0x9a   : > { %877 = vmatpush1.bf16.msra.mxu0 %v876_v26  ;;  %935 = vmatpush1.bf16.msra.mxu1 %v876_v26 }
  0x9b   : > { %879 = vmatprep.subr.bf16.mxu0 %v878_v27  ;;  %928 = vmatprep.subr.bf16.mxu1 %v878_v27 }
  0x9e   : > { %881 = vmatpush1.bf16.msra.mxu0 %v880_v32  ;;  %936 = vmatpush1.bf16.msra.mxu1 %v880_v32 }
  0x9f   : > { %883 = vmatprep.subr.bf16.mxu0 %v882_v33  ;;  %929 = vmatprep.subr.bf16.mxu1 %v882_v33 }
  0xa2   : > { %885 = vmatpush1.bf16.msra.mxu0 %v884_v38  ;;  %937 = vmatpush1.bf16.msra.mxu1 %v884_v38 }
  0xa3   : > { %887 = vmatprep.subr.bf16.mxu0 %v886_v39  ;;  %930 = vmatprep.subr.bf16.mxu1 %v886_v39 }
  0xa6   : > { %889 = vmatpush1.bf16.msra.mxu0 %v888_v44  ;;  %938 = vmatpush1.bf16.msra.mxu1 %v888_v44 }
  0xa7   : > { %891 = vmatprep.subr.bf16.mxu0 %v890_v45  ;;  %931 = vmatprep.subr.bf16.mxu1 %v890_v45 }
  0xaa   : > { %893 = vmatpush1.bf16.msra.mxu0 %v892_v48  ;;  %939 = vmatpush1.bf16.msra.mxu1 %v892_v48 }
  0xad   : > { %335 = vmatmul.mubr.f32.vlgmr.msra.gmra.mrb[0].mxu0 %v236_v49  ;;  %341 = vmatmul.mubr.f32.vlgmr.msra.gmra.mrb[0].mxu1 %v237_v50 }
 0x180   : > { %v336_v51 = vpop.f32.mrb[0].mxu0  ;;  %v342_v52 = vpop.f32.mrb[0].mxu1 }
 0x181   : > { %347 = vst [vmem:[#allocation2] sm:$0xff] %v336_v51  ;;  %348 = vst [vmem:[#allocation2 + $0x8] sm:$0xff] %v342_v52  ;;  %v338_v53 = vpop.f32.mrb[1].mxu0  ;;  %v344_v54 = vpop.f32.mrb[1].mxu1 }
 0x182   : > { %349 = vst [vmem:[#allocation3] sm:$0xff] %v338_v53  ;;  %350 = vst [vmem:[#allocation3 + $0x8] sm:$0xff] %v344_v54 }
 0x183 PF: > { %v354_v55 = vld [vmem:[#allocation7] sm:$0xff]  ;;  %v355_v56 = vld [vmem:[#allocation7 + $0x8] sm:$0xff]  ;;  %v356_v57 = vld [vmem:[#allocation7 + $0x10] sm:$0xff]  ;;  %v1347_v58 = vmov 0.0|0.0   ;;  %vm1348_vm0 = vmmov 0   ;;  %v1349_v61 = vmov 0.0  }
 0x184   : > { %894 = vmatprep.subr.bf16.mxu0 %v1347_v58  ;;  %v895_v59 = vpack.c.bf16 %v355_v56, %v354_v55  ;;  %v357_v60 = vld [vmem:[#allocation7 + $0x18] sm:$0xff]  ;;  %845 = vmatprep.mubr.msk.f32.mxu0 %vm1348_vm0, %v1349_v61  ;;  %v358_v63 = vld [vmem:[#allocation7 + $0x20] sm:$0xff]  ;;  %v359_v0 = vld [vmem:[#allocation7 + $0x28] sm:$0xff]  ;;  %s780_s25 = sshll.u32 %s1309_s18, 3  ;;  %vm520_vm2 = vcmask 130048   ;;  %v1350_v31 = vmov 2147483648  }
 0x185   : > { %918 = vmatprep.subr.bf16.mxu1 %v1347_v58  ;;  %852 = vmatprep.mubr.msk.f32.mxu1 %vm1348_vm0, %v1349_v61  ;;  %v898_v62 = vpack.c.bf16 %v357_v60, %v356_v57  ;;  %v901_v3 = vpack.c.bf16 %v359_v0, %v358_v63  ;;  %v360_v5 = vld [vmem:[#allocation7 + $0x30] sm:$0xff]  ;;  %v361_v6 = vld [vmem:[#allocation7 + $0x38] sm:$0xff]  ;;  %v362_v8 = vld [vmem:[#allocation7 + $0x40] sm:$0xff]  ;;  %s352_s27 = scalar_lea.vmem %s1597_s12, %s780_s25 [#allocation4]  ;;  %v1327_v33 = vmov 1073741824   ;;  %s1335_s4 = smov 0  }
 0x186   : > { %896 = vmatpush3.bf16.msra.mxu0 %v895_v59  ;;  %v904_v7 = vpack.c.bf16 %v361_v6, %v360_v5  ;;  %v363_v9 = vld [vmem:[#allocation7 + $0x48] sm:$0xff]  ;;  %v364_v11 = vld [vmem:[#allocation7 + $0x50] sm:$0xff]  ;;  %v365_v12 = vld [vmem:[#allocation7 + $0x58] sm:$0xff] }
 0x187   : > { %897 = vmatprep.subr.bf16.mxu0 %v1347_v58  ;;  %v907_v10 = vpack.c.bf16 %v363_v9, %v362_v8  ;;  %v910_v13 = vpack.c.bf16 %v365_v12, %v364_v11  ;;  %v366_v14 = vld [vmem:[#allocation7 + $0x60] sm:$0xff]  ;;  %v367_v15 = vld [vmem:[#allocation7 + $0x68] sm:$0xff]  ;;  %v368_v17 = vld [vmem:[#allocation7 + $0x70] sm:$0xff] }
 0x188   : > { %v441_v1 = vld [vmem:[#allocation2] sm:$0xff]  ;;  %v442_v2 = vld [vmem:[#allocation2 + $0x8] sm:$0xff]  ;;  %v913_v16 = vpack.c.bf16 %v367_v15, %v366_v14  ;;  %v369_v18 = vld [vmem:[#allocation7 + $0x78] sm:$0xff] }
 0x189   : > { %v919_v4 = vpack.c.bf16 %v442_v2, %v441_v1  ;;  %v916_v19 = vpack.c.bf16 %v369_v18, %v368_v17  ;;  %v353_v20 = vld [vmem:[%s352_s27] sm:$0xff] }
 0x18a   : > { %899 = vmatpush3.bf16.msra.mxu0 %v898_v62 }
 0x18b   : > { %900 = vmatprep.subr.bf16.mxu0 %v1347_v58  ;;  %920 = vmatpush3.bf16.xpose.msra.mxu1 %v919_v4 }
 0x18e   : > { %902 = vmatpush3.bf16.msra.mxu0 %v901_v3 }
 0x18f   : > { %903 = vmatprep.subr.bf16.mxu0 %v1347_v58 }
 0x192   : > { %905 = vmatpush3.bf16.msra.mxu0 %v904_v7 }
 0x193   : > { %906 = vmatprep.subr.bf16.mxu0 %v1347_v58 }
 0x196   : > { %908 = vmatpush3.bf16.msra.mxu0 %v907_v10 }
 0x197   : > { %909 = vmatprep.subr.bf16.mxu0 %v1347_v58 }
 0x19a   : > { %911 = vmatpush3.bf16.msra.mxu0 %v910_v13 }
 0x19b   : > { %912 = vmatprep.subr.bf16.mxu0 %v1347_v58 }
 0x19e   : > { %914 = vmatpush3.bf16.msra.mxu0 %v913_v16 }
 0x19f   : > { %915 = vmatprep.subr.bf16.mxu0 %v1347_v58 }
 0x1a2   : > { %917 = vmatpush3.bf16.msra.mxu0 %v916_v19 }
 0x1a5   : > { %846 = vmatmul.mubr.f32.vlgmr.msra.gmra.mrb[0].mxu0 %v353_v20 }
 0x278   : > { %v436_v21 = vpop.f32.mrb[0].mxu0 }
 0x279   : > { %v440_v22 = vmul.f32 0.088388346, %v436_v21  ;;  %v847_v23 = vpop.f32.mrb[1].mxu0 }
 0x27b   : > { %853 = vmatmul.mubr.f32.vlgmr.msra.gmra.mrb[0].mxu1 %v440_v22 }
 0x34e   : > { %v509_v24 = vpop.f32.mrb[0].mxu1 }
 0x34f   : > { %vm514_vm1 = vcmp.lt.s32.totalorder %v509_v24, 0  ;;  %v515_v25 = vxor.u32 2147483647, %v509_v24  ;;  %v854_v26 = vpop.f32.mrb[1].mxu1 }
 0x351   : > { %v516_v27 = vsel %vm514_vm1, %v515_v25, %v509_v24 }
 0x352   : > { %vm517_vm3 = vcmp.ge.s32.totalorder %v516_v27, 0 }
 0x353   : > { %v781_v28 = vsel %vm517_vm3, 1.0, %v1349_v61 }
 0x354   : > { %v521_v29 = vsel %vm520_vm2, %v781_v28, 0.0 }
 0x355   : > { %522 = vadd.xlane.f32.xlu0 %v521_v29 }
 0x3e2   : > { %v523_v30 = vpop.xlane.xlu0 %522 }
 0x3e3   : > { %vm524_vm4 = vcmp.ge.f32.partialorder %v523_v30, 12.0 }
 0x3e4   : > { %v525_v32 = vsel %vm524_vm4, 0, %v1350_v31  }
 0x3e5   : > { %v1331_v34 = vmov %v525_v32  }
 0x3e6 LB: >> { %v534_v35 = vadd.s32 %v1329_v33, %v1333_v34  ;;  %v543_v33 = vshra.s32 %v1329_v33, 1   ;;  %v1351_v36 = vmov 0.0   ;;  %s531_s4 = sadd.s32 1, %s1337_s4   ;;  %s1337_s4 = sphi %s1335_s4, %s531_s4   ;;  %v1333_v34 = vphi %v1331_v34, %v1332_v34   ;;  %v1329_v33 = vphi %v1327_v33, %v543_v33  }
 0x3e7   : >> { %p528_p3 = scmp.ge.s32.totalorder %s531_s4, 31  }
 0x3e8   : >> { %vm535_vm5 = vcmp.ge.s32.totalorder %v516_v27, %v534_v35  ;;  %921 = vmatprep.subr.bf16.mxu1 (%p528_p3), %v1347_v58  ;;  %859 = vmatprep.mubr.msk.f32.mxu1 (%p528_p3), %vm1348_vm0, %v1349_v61  ;;  %v558_v49 = vld [vmem:[#allocation3] sm:$0xff] (%p528_p3)  ;;  %v559_v50 = vld [vmem:[#allocation3 + $0x8] sm:$0xff] (%p528_p3)  ;;  %s785_s7 = sshll.u32 (%p528_p3), %s1313_s19, 1  ;;  %s650_s29 = sshll.u32 (%p528_p3), %s231_s9, 4  ;;  %s1649_s29 = int_to_ptr.vmem [resolvable:$true] %s650_s29 }
 0x3e9   : >> { %v782_v37 = vsel %vm535_vm5, 1.0, %v1351_v36  ;;  %v922_v51 = vpack.c.bf16 (%p528_p3), %v559_v50, %v558_v49  ;;  %s646_s8 = sadd.s32 (%p528_p3), %s1309_s18, %s785_s7  ;;  %s635_s19 = scalar_lea.sflag (%p528_p3), [#allocation6], %s229_s20 }
 0x3ea   : >> { %v538_v38 = vsel %vm520_vm2, %v782_v37, 0.0  ;;  %s786_s26 = sshll.u32 (%p528_p3), %s646_s8, 7  ;;  %s1187_s18 = scalar_lea.vmem (%p528_p3), %s1649_s29, 128 }
 0x3eb   : >> { %539 = vadd.xlane.f32.xlu0 %v538_v38  ;;  %923 = vmatpush3.bf16.msra.mxu1 (%p528_p3), %v922_v51  ;;  %s1647_s1 = scalar_lea.hbm (%p528_p3), %s1716_s3, %s786_s26  ;;  %p1188_p7 = scmp.ne.s32.totalorder (%p528_p3), %s1649_s29, %s1187_s18 }
 0x3ec   : > { %p1750_p13 = scmp.ne.s32.totalorder (%p528_p3), %s1734_s28, 0  ;;  %s1352_s15 = smov (%p528_p3), [#allocation10]  }
 0x3ed   : > { %s1191_s6 = sshll.u32 (%p528_p3), %s1352_s15, 4  ;;  %s1192_s6 = int_to_ptr.vmem [resolvable:$false] %s1191_s6 }
 0x3ee   : > { %p1189_p9 = pnand (%p528_p3), %p1188_p7, %p1750_p13  ;;  %s1193_s5 = scalar_lea.vmem (%p528_p3), %s1192_s6, 256 }
 0x3ef   : > { %p1194_p0 = scmp.lt.s32.totalorder (%p528_p3), %s1649_s29, %s1192_s6  ;;  %p1195_p5 = scmp.lt.s32.totalorder (%p528_p3), %s1193_s5, %s1187_s18 }
 0x3f0   : > { %p1190_p11 = pneg (%p528_p3), %p1189_p9 }
 0x3f1   : > { %p1196_p8 = por (%p528_p3), %p1195_p5, %p1194_p0 }
 0x3f3   : > { %p1197_p12 = pnand (%p528_p3), %p1196_p8, %p1190_p11 }
 0x475   : > { %530 = sbr.rel (!%p528_p3) target bundleno = 998 (0x3e6), region = 97 }
 0x478   : >> { %v540_v39 = vpop.xlane.xlu0 %539 }
 0x479   : >> { %vm541_vm6 = vcmp.ge.f32.partialorder %v540_v39, 12.0 }
 0x47a   : >> { %v542_v40 = vsel %vm541_vm6, %v534_v35, %v1333_v34  }
 0x47b   : >> { %v1332_v34 = vmov %v542_v40   ;;  %vm544_vm7 = vcmp.ge.s32.totalorder (%p528_p3), %v516_v27, %v542_v40 }
 0x47c   : > { %v545_v41 = vsel %vm544_vm7, %v509_v24, -1e+10 }
 0x47d   : > { %v546_v42 = vsel %vm520_vm2, %v545_v41, -inf }
 0x47e   : > { %547 = vmax.xlane.f32.xlu0 %v546_v42 }
 0x50b   : > { %v548_v43 = vpop.xlane.xlu0 %547 }
 0x50c   : > { %v549_v44 = vsub.f32 %v509_v24, %v548_v43 }
 0x50e   : > { %v550_v45 = vmul.f32 1.442695, %v549_v44 }
 0x510   : > { %1097 = vpow2.f32 %v550_v45 }
 0x51a   : > { %v1098_v46 = vpop.eup %1097 }
 0x51b   : > { %v552_v47 = vsel %vm544_vm7, %v1098_v46, 0.0 }
 0x51c   : > { %v553_v48 = vsel %vm520_vm2, %v552_v47, 0.0 }
 0x51d   : > { %554 = vadd.xlane.f32.xlu0 %v553_v48 }
 0x5aa   : > { %v555_v52 = vpop.xlane.xlu0 %554 }
 0x5ab   : > { %1099 = vrcp.f32 %v555_v52 }
 0x5b5   : > { %v1100_v53 = vpop.eup %1099 }
 0x5b6   : > { %v557_v54 = vmul.f32 %v1100_v53, %v552_v47 }
 0x5b8   : > { %860 = vmatmul.mubr.msk.f32.vlgmr.msra.gmra.mrb[2].mxu1 %vm520_vm2, %v557_v54 }
 0x68b   : > { %v629_v55 = vpop.f32.mrb[2].mxu1 }
 0x68c   : > { %633 = vst [vmem:[%s231_s9] sm:$0xff] %v629_v55  ;;  %v861_v56 = vpop.f32.mrb[3].mxu1 }
 0x68d   : > { %1200 = shalt.err (!%p1197_p12)
}
 0x68e   : > { %s1201_s12 = scalar_lea.hbm %s1647_s1, 128  ;;  %s1205_s9 = scalar_lea.hbm %s1716_s3, 512 }
 0x68f   : > { %p1202_p2 = scmp.ne.s32.totalorder %s1647_s1, %s1201_s12  ;;  %p1206_p1 = scmp.lt.u32.totalorder %s1647_s1, %s1716_s3 }
 0x690   : > { %p1207_p4 = scmp.lt.u32.totalorder %s1205_s9, %s1201_s12  ;;  %p1209_p7 = scmp.lt.u32.totalorder %s1201_s12, %s1647_s1 }
 0x691   : > { %p1203_p6 = pnand %p1202_p2, %p1750_p13 }
 0x692   : > { %p1208_p3 = por %p1207_p4, %p1206_p1 }
 0x693   : > { %p1204_p10 = pneg %p1203_p6 }
 0x694   : > { %p1210_p9 = por %p1209_p7, %p1208_p3 }
 0x696   : > { %p1211_p11 = pnand %p1210_p9, %p1204_p10 }
 0x698   : > { %1214 = shalt.err (!%p1211_p11)
}
 0x699   : > { %950 = dma.vmem_to_hbm [thread:$0]  (%p1750_p13), %s1649_s29, 128, %s1647_s1, %s635_s19  }
 0x69a PF: > { %s1751_s4 = sld [smem:[#allocation14_spill]]  ;;  %s1752_s7 = sld [smem:[#allocation16_spill]] }
 0x69b   : > { %p972_p0 = scmp.ge.s32.totalorder %s1325_s22, 2 }
 0x6a0   : > { %s662_s8 = sand.u32 1, %s1751_s4   ;;  %p1753_p5 = scmp.ne.s32.totalorder %s1752_s7, 0 }
 0x6a1   : > { %s663_s26 = scalar_lea.sflag [#allocation6], %s662_s8 }
 0x6a2   : > { %p964_p8 = pnand %p972_p0, %p1753_p5 }
 0x6a4   : > { %1280 = dma.done.wait (!%p964_p8), %s663_s26, 128  }
 0x6a5   : > { %1282 = vsyncadd (!%p964_p8), %s663_s26, 4294967168  ;;  %s20_s22 = sadd.s32 1, %s1325_s22   ;;  %s1754_s18 = sld [smem:[#allocation15_spill]] }
 0x6a6   : > { %p17_p12 = scmp.ge.s32.totalorder %s20_s22, 6   ;;  %s1755_s20 = sld [smem:[#allocation17_spill]] }
 0x6a7   : > { %s1756_s12 = smov %s1289_s13  ;;  %s1757_s13 = smov %s1293_s14 }
 0x6a8   : > { %s1758_s14 = smov %s1551_s2  ;;  %s1759_s15 = smov %s1301_s16 }
 0x6a9   : > { %s1760_s16 = smov %s1305_s17  ;;  %s1761_s17 = smov %s1546_s10 }
 0x6aa   : > { %s1762_s19 = smov %s1321_s21  ;;  %s1763_s21 = smov %s1769_s23 }
 0x6ab   :  { %19 = sbr.rel (!%p17_p12) target bundleno = 13 (0xd), region = 108 }
 0x6b2   :  { %668 = vsyncpa [#allocation5], 1 }
 0x6b3   :  { %670 = vsyncpa [#allocation5 + $0x1], 1 }
 0x6b4   :  { %671 = vsyncpa [#allocation8], 1 }
 0x6b5   :  { %672 = vsyncpa [#allocation6], 1 }
 0x6b6   :  { %674 = vsyncpa [#allocation6 + $0x1], 1 }

</bundles_post_ra>
